<compile_context>
chip_gen: v6e
topology: v6e:2x2x1
jax: 0.10.0
libtpu: 0.0.40
codegen_flags: <defaults>
</compile_context>

<pallas_src>
import functools

import jax
import jax.numpy as jnp
from jax.experimental import pallas as pl
from jax.experimental.pallas import tpu as pltpu


def _spd_log_kernel(u_ref, s_ref, o_ref):
    # u_ref: (BT, n, n) eigenvectors for this block of matrices
    # s_ref: (BT, 1, n) eigenvalues for this block
    # o_ref: (BT, n, n) output = u @ diag(log s) @ u^T
    u = u_ref[...]                                  # (BT, n, n)
    s = s_ref[...]                                  # (BT, 1, n)
    tiny = jnp.finfo(s.dtype).tiny
    logs = jnp.log(jnp.maximum(s, tiny))            # clamp: avoid -inf/NaN
    scaled = u * logs                               # == u @ diag(log s)  (scale columns)
    # out[b, i, k] = sum_j scaled[b, i, j] * u[b, k, j]  -- contraction on the
    # last dims of both operands; no transposed copy of u is needed.
    out = jnp.einsum(
        "bij,bkj->bik", scaled, u, preferred_element_type=jnp.float32
    )
    o_ref[...] = out.astype(o_ref.dtype)


def _pick_block_b(B, n):
    """Matrices per grid step: ~2 MiB f32 input block, capped, >=2 blocks if possible."""
    target_bytes = 2 << 20
    bt = max(1, target_bytes // (4 * n * n))
    bt = min(bt, 512, B)
    if B > bt:
        # keep at least 2 grid blocks so v7x's two TensorCores both get work
        bt = min(bt, pl.cdiv(B, 2))
    return int(max(1, bt))


@functools.partial(jax.jit, static_argnames=())
def spd_tangent_space(x):
    """x: (B, n, n) SPD matrices -> (B, n*n) flattened matrix log."""
    B, n, _ = x.shape

    # Eigendecomposition (glue; no Pallas equivalent).
    s, u = jnp.linalg.eigh(x)                       # s: (B, n), u: (B, n, n)

    bt = _pick_block_b(B, n)
    grid_b = pl.cdiv(B, bt)
    Bp = grid_b * bt
    if Bp != B:
        # Pad with identity matrices / unit eigenvalues (log == 0, no NaNs);
        # padded rows are dropped after the kernel.
        pad = Bp - B
        eye = jnp.broadcast_to(jnp.eye(n, dtype=u.dtype), (pad, n, n))
        u = jnp.concatenate([u, eye], axis=0)
        s = jnp.concatenate([s, jnp.ones((pad, n), dtype=s.dtype)], axis=0)

    s = s.reshape(Bp, 1, n)                         # tile-friendly last two dims

    flops = 2 * B * n * n * n + B * n * n           # batched matmul + column scaling
    bytes_accessed = 4 * (2 * B * n * n + B * n)    # read u, write out, read s
    transcendentals = B * n                         # log per eigenvalue

    out = pl.pallas_call(
        _spd_log_kernel,
        out_shape=jax.ShapeDtypeStruct((Bp, n, n), x.dtype),
        grid_spec=pltpu.PrefetchScalarGridSpec(
            num_scalar_prefetch=0,
            grid=(grid_b,),
            in_specs=[
                pl.BlockSpec((bt, n, n), lambda b: (b, 0, 0)),
                pl.BlockSpec((bt, 1, n), lambda b: (b, 0, 0)),
            ],
            out_specs=pl.BlockSpec((bt, n, n), lambda b: (b, 0, 0)),
        ),
        compiler_params=pltpu.CompilerParams(
            dimension_semantics=("parallel",),
        ),
        cost_estimate=pl.CostEstimate(
            flops=int(flops),
            transcendentals=int(transcendentals),
            bytes_accessed=int(bytes_accessed),
        ),
    )(u, s)

    if Bp != B:
        out = out[:B]

    # torch.flatten(output, 1): row-major, contiguous -> free reshape in XLA.
    return out.reshape(B, n * n)


def _reference(x):
    s, u = jnp.linalg.eigh(x)
    logm = jnp.einsum("bij,bj,bkj->bik", u, jnp.log(s), u)
    return logm.reshape(x.shape[0], -1)


if __name__ == "__main__":
    B, n = 4, 16
    key = jax.random.PRNGKey(0)
    a = jax.random.normal(key, (B, n, n), dtype=jnp.float32)
    # Build well-conditioned SPD matrices: A A^T + n * I
    x = jnp.einsum("bij,bkj->bik", a, a) + n * jnp.eye(n, dtype=jnp.float32)[None]

    out = spd_tangent_space(x)
    out = jax.block_until_ready(out)

    ref = _reference(x)
    assert out.shape == (B, n * n), out.shape
    assert jnp.allclose(out, ref, atol=1e-3, rtol=1e-3), float(
        jnp.max(jnp.abs(out - ref))
    )
    print("KERNEL_OK")
</pallas_src>

<mosaic_0001>
module attributes {stable_mosaic.version = 11 : i64} {
  func.func @_spd_log_kernel(%arg0: i32, %arg1: memref<4x16x16xf32, #tpu.memory_space<vmem>>, %arg2: memref<4x1x16xf32, #tpu.memory_space<vmem>>, %arg3: memref<4x16x16xf32, #tpu.memory_space<vmem>>) attributes {dimension_semantics = [#tpu.dimension_semantics<parallel>], iteration_bounds = array<i64: 1>, scalar_prefetch = 0 : i64, scratch_operands = 0 : i64, tpu.core_type = #tpu.core_type<tc>, window_params = [{transform_indices = @transform_0, window_bounds = array<i64: 4, 16, 16>}, {transform_indices = @transform_1, window_bounds = array<i64: 4, 1, 16>}, {transform_indices = @transform_2, window_bounds = array<i64: 4, 16, 16>}]} {
    %c0 = arith.constant 0 : index
    %c0_0 = arith.constant 0 : index
    %c0_1 = arith.constant 0 : index
    %0 = vector.load %arg1[%c0, %c0_0, %c0_1] : memref<4x16x16xf32, #tpu.memory_space<vmem>>, vector<4x16x16xf32>
    %c0_2 = arith.constant 0 : index
    %c0_3 = arith.constant 0 : index
    %c0_4 = arith.constant 0 : index
    %1 = vector.load %arg2[%c0_2, %c0_3, %c0_4] : memref<4x1x16xf32, #tpu.memory_space<vmem>>, vector<4x1x16xf32>
    %cst = arith.constant 1.17549435E-38 : f32
    %2 = vector.broadcast %cst : f32 to vector<4x1x16xf32>
    %3 = arith.maximumf %1, %2 : vector<4x1x16xf32>
    %4 = math.log %3 : vector<4x1x16xf32>
    %5 = vector.broadcast %4 : vector<4x1x16xf32> to vector<4x16x16xf32>
    %6 = arith.mulf %0, %5 : vector<4x16x16xf32>
    "tpu.trace_start"() <{level = 10 : i32, message = "bij,bkj->bik"}> : () -> ()
    %cst_5 = arith.constant dense<0.000000e+00> : vector<4x16x16xf32>
    %7 = tpu.matmul %6, %0, %cst_5 {dimension_numbers = #tpu.dot_dimension_numbers<[2], [2], [1], [1], [0, 0, 0, 1, 1, 1], [0], [0]>} : vector<4x16x16xf32>, vector<4x16x16xf32>, vector<4x16x16xf32> -> vector<4x16x16xf32>
    "tpu.trace_stop"() : () -> ()
    %c0_6 = arith.constant 0 : index
    %c0_7 = arith.constant 0 : index
    %c0_8 = arith.constant 0 : index
    %8 = vector.load %arg3[%c0_6, %c0_7, %c0_8] : memref<4x16x16xf32, #tpu.memory_space<vmem>>, vector<4x16x16xf32>
    tpu.vector_store %arg3[%c0_6, %c0_7, %c0_8], %7 {strides = array<i32>} : memref<4x16x16xf32, #tpu.memory_space<vmem>>, vector<4x16x16xf32>,
    return
  }
  func.func @transform_0(%arg0: i32) -> (i32, i32, i32) {
    %c0_i32 = arith.constant 0 : i32
    %c0_i32_0 = arith.constant 0 : i32
    %c0_i32_1 = arith.constant 0 : i32
    return %arg0, %c0_i32, %c0_i32_0 : i32, i32, i32
  }
  func.func @transform_1(%arg0: i32) -> (i32, i32, i32) {
    %c0_i32 = arith.constant 0 : i32
    %c0_i32_0 = arith.constant 0 : i32
    %c0_i32_1 = arith.constant 0 : i32
    return %arg0, %c0_i32, %c0_i32_0 : i32, i32, i32
  }
  func.func @transform_2(%arg0: i32) -> (i32, i32, i32) {
    %c0_i32 = arith.constant 0 : i32
    %c0_i32_0 = arith.constant 0 : i32
    %c0_i32_1 = arith.constant 0 : i32
    return %arg0, %c0_i32, %c0_i32_0 : i32, i32, i32
  }
}

</mosaic_0001>

<bundles_post_ra>
// kernel: custom-call.2
= control target key start
LH: loop header
LB: loop body
LE: loop exit
PB: predicated region body
PF: predicated region fallthrough
CT: control target
= control target key end

     0   :  { %s1688_s30 = smov 0   ;;  %s1690_s10 = smov 0   ;;  %s1997_s0 = inlined_call_operand.vmem [shape: f32[4,8,8], index: 0, kind: input, shape index: {}]   ;;  %s1998_s1 = inlined_call_operand.vmem [shape: f32[4,8,8], index: 1, kind: input, shape index: {}]   ;;  %s1999_s2 = inlined_call_operand.vmem [shape: f32[4,8,8], index: 2, kind: input, shape index: {}]   ;;  %s2000_s3 = inlined_call_operand.vmem [shape: f32[4,8,8], index: 3, kind: input, shape index: {}]   ;;  %s2001_s4 = inlined_call_operand.vmem [shape: f32[4,8], index: 4, kind: output, shape index: {0}]   ;;  %s2002_s5 = inlined_call_operand.vmem [shape: f32[4,8], index: 5, kind: output, shape index: {1}]   ;;  %s2003_s6 = inlined_call_operand.vmem [shape: f32[4,8,8], index: 6, kind: output, shape index: {2}]   ;;  %s2004_s7 = inlined_call_operand.vmem [shape: f32[4,8,8], index: 7, kind: output, shape index: {3}]   ;;  %s2005_s8 = inlined_call_operand.vmem [shape: f32[4,8,8], index: 8, kind: output, shape index: {4}]   ;;  %s2006_s9 = inlined_call_operand.vmem [shape: f32[4,8,8], index: 9, kind: output, shape index: {5}]  }
   0x1   :  { %s1692_s11 = smov 0  }
   0x2 LB: > { %s1704_s12 = sadd.s32 4294967295, %s1625_s11   ;;  %s1707_s13 = sadd.s32 1, %s1625_s11   ;;  %s1625_s11 = sphi %s1692_s11, %s2015_s11   ;;  %s1621_s10 = sphi %s1690_s10, %s2014_s10   ;;  %s1617_s30 = sphi %s1688_s30, %s2013_s30  }
   0x3   : > { %s20_s14 = sshrl.u32 %s1625_s11, 3  ;;  %s21_s15 = sshrl.u32 %s1707_s13, 3 }
   0x4   : > { %s22_s16 = ssub.s32 %s20_s14, %s21_s15  ;;  %s25_s17 = sadd.s32 1, %s1621_s10 }
   0x5   : > { %p23_p0 = scmp.eq.s32.totalorder %s22_s16, 0  ;;  %p35_p1 = scmp.ne.s32.totalorder %s1621_s10, %s1617_s30 }
   0x6   : > { %p36_p2 = scmp.eq.s32.totalorder %s1704_s12, 3  ;;  %p1486_p4 = scmp.ge.s32.totalorder %s1625_s11, 4 }
   0x7   : > { %s1716_s18 = scalar_select %p23_p0, %s1621_s10, %s25_s17  }
   0x8   : > { %p1718_p3 = por %p36_p2, %p35_p1  ;;  %86 = sbr.rel (%p1486_p4) target bundleno = 18 (0x12), region = 16 }
   0x9   : > { %2007 = sst [smem:[#allocation25_spill]] %s1716_s18  ;;  %s88_s20 = sand.u32 (!%p1486_p4), 1, %s1625_s11  }
   0xa   : > { %s1488_s21 = sshll.u32 (!%p1486_p4), %s1625_s11, 3  ;;  %s1487_s22 = sshll.u32 (!%p1486_p4), %s88_s20, 3 }
   0xb   : > { %s92_s25 = scalar_lea.vmem (!%p1486_p4), %s1997_s0, %s1488_s21  ;;  %s90_s26 = scalar_lea.vmem (!%p1486_p4), [#allocation0], %s1487_s22 }
   0xc   : > { %s131_s29 = scalar_lea.vmem (!%p1486_p4), %s1998_s1, %s1488_s21  ;;  %s170_s16 = scalar_lea.vmem (!%p1486_p4), %s1999_s2, %s1488_s21 }
   0xd   : > { %v121_v0 = vld [vmem:[%s92_s25] sm:$0xff]  ;;  %s129_s17 = scalar_lea.vmem [#allocation1], %s1487_s22  ;;  %s209_s23 = scalar_lea.vmem %s2000_s3, %s1488_s21 }
   0xe   : > { %122 = vst [vmem:[%s90_s26] sm:$0xff] %v121_v0  ;;  %v160_v1 = vld [vmem:[%s131_s29] sm:$0xff]  ;;  %s168_s24 = scalar_lea.vmem [#allocation2], %s1487_s22  ;;  %s207_s25 = scalar_lea.vmem [#allocation3], %s1487_s22 }
   0xf   : > { %161 = vst [vmem:[%s129_s17] sm:$0xff] %v160_v1  ;;  %v199_v2 = vld [vmem:[%s170_s16] sm:$0xff] }
  0x10   : > { %200 = vst [vmem:[%s168_s24] sm:$0xff] %v199_v2  ;;  %v238_v3 = vld [vmem:[%s209_s23] sm:$0xff] }
  0x11   : > { %239 = vst [vmem:[%s207_s25] sm:$0xff] %v238_v3 }
  0x12 PF: > { %p1495_p5 = scmp.ge.s32.totalorder %s1625_s11, 1  ;;  %p244_p6 = scmp.lt.s32.totalorder %s1625_s11, 5 }
  0x14   : > { %p245_p7 = pnand %p1495_p5, %p244_p6 }
  0x16   : > { %248 = sbr.rel (%p245_p7) target bundleno = 987 (0x3db), region = 156 }
  0x1b   : > { %s251_s26 = sand.u32 1, %s1704_s12   ;;  %s285_s27 = sand.u32 1, %s1617_s30   ;;  %v329_v4 = vlaneseq  ;;  %v1635_v11 = vmov 0.0  }
  0x1c   : > { %s1496_s28 = sshll.u32 %s251_s26, 3  ;;  %s1741_s18 = sshll.u32 %s285_s27, 2 }
  0x1d   : > { %v1743_v5 = vand.u32 127, %v329_v4  ;;  %v1745_v6 = vshrl.u32 %v329_v4, 7  ;;  %s253_s21 = scalar_lea.vmem [#allocation0], %s1496_s28  ;;  %s257_s22 = scalar_lea.vmem [#allocation1], %s1496_s28 }
  0x1e   : > { %v313_v7 = vld [vmem:[%s253_s21] sm:$0xff]  ;;  %v316_v8 = vld [vmem:[%s257_s22] sm:$0xff]  ;;  %s261_s29 = scalar_lea.vmem [#allocation2], %s1496_s28  ;;  %s265_s11 = scalar_lea.vmem [#allocation3], %s1496_s28 }
  0x1f   : > { %v319_v9 = vld [vmem:[%s261_s29] sm:$0xff]  ;;  %v322_v10 = vld [vmem:[%s265_s11] sm:$0xff]  ;;  %s1747_s14 = scalar_lea.vmem [#allocation8], %s1496_s28  ;;  %s1750_s30 = scalar_lea.vmem [#allocation9], %s1496_s28  ;;  %v331_v5 = vmov %v1743_v5  ;;  %v334_v6 = vmov %v1745_v6  ;;  %vm1375_vm2 = vcmp.lt.s32.totalorder %v1743_v5, 8 }
  0x20   : > { %324 = vst [vmem:[%s1747_s14] sm:$0xff] %v1635_v11  ;;  %325 = vst [vmem:[%s1750_s30] sm:$0xff] %v1635_v11  ;;  %s312_s15 = smov [#allocation12]  ;;  %s315_s16 = smov [#allocation13]  ;;  %v344_v5 = vmov %v1743_v5  ;;  %v347_v6 = vmov %v1745_v6  ;;  %vm338_vm0 = vcmp.eq.s32.totalorder %v334_v6, %v331_v5 }
  0x21   : > { %s1753_s17 = scalar_lea.vmem [#allocation10], %s1496_s28  ;;  %s1756_s20 = scalar_lea.vmem [#allocation11], %s1496_s28  ;;  %314 = vst [vmem:[%s312_s15] sm:$0xff] %v313_v7  ;;  %317 = vst [vmem:[%s315_s16] sm:$0xff] %v316_v8  ;;  %vm351_vm1 = vcmp.eq.s32.totalorder %v347_v6, %v344_v5  ;;  %v1367_v5 = vmov %v1743_v5  ;;  %v1370_v6 = vmov %v1745_v6 }
  0x22   : > { %326 = vst [vmem:[%s1753_s17] sm:$0xff] %v1635_v11  ;;  %327 = vst [vmem:[%s1756_s20] sm:$0xff] %v1635_v11  ;;  %s318_s23 = smov [#allocation14]  ;;  %s321_s24 = smov [#allocation15]  ;;  %vm1380_vm3 = vcmp.eq.s32.totalorder %v1370_v6, %v1367_v5  ;;  %v1418_v5 = vmov %v1743_v5  ;;  %v1387_v6 = vmov %v1745_v6 }
  0x23   : > { %320 = vst [vmem:[%s318_s23] sm:$0xff] %v319_v9  ;;  %323 = vst [vmem:[%s321_s24] sm:$0xff] %v322_v10  ;;  %s328_s14 = smov %s1747_s14  ;;  %s341_s20 = smov %s1756_s20  ;;  %v1384_v5 = vmov %v1743_v5  ;;  %v1421_v6 = vmov %v1745_v6 }
  0x24   : > { %s287_s25 = scalar_lea.vmem [#allocation5], %s1741_s18  ;;  %s1371_s27 = smov [#allocation12]  ;;  %v1401_v5 = vmov %v1743_v5  ;;  %v1404_v6 = vmov %v1745_v6  ;;  %vm1431_vm4 = vcmp.eq.s32.totalorder %v1421_v6, %v1418_v5 }
  0x25   : > { %s1388_s28 = smov [#allocation13]  ;;  %s1405_s21 = smov [#allocation14] }
  0x26   : > { %s1422_s22 = smov [#allocation15] }
  0x27   : > { %v335_v12 = vld [vmem:[%s328_s14] sm:$0xff] }
  0x28   : > { %v339_v13 = vsel %vm338_vm0, 1.0, %v335_v12  ;;  %v1377_v16 = vld [vmem:[%s1371_s27] sm:$0xff] }
  0x29   : > { %v348_v14 = vld [vmem:[%s341_s20] sm:$0xff]  ;;  %340 = vst [vmem:[%s328_s14] sm:$0xff] %v339_v13  ;;  %v1378_v18 = vsel %vm1375_vm2, %v1377_v16, 0.0 }
  0x2a   : > { %v352_v15 = vsel %vm351_vm1, 1.0, %v348_v14  ;;  %v1394_v17 = vld [vmem:[%s1388_s28] sm:$0xff]  ;;  %v1379_v22 = vmul.f32 %v1378_v18, %v1378_v18 }
  0x2b   : > { %353 = vst [vmem:[%s341_s20] sm:$0xff] %v352_v15  ;;  %v1395_v19 = vsel %vm1375_vm2, %v1394_v17, 0.0  ;;  %v1411_v20 = vld [vmem:[%s1405_s21] sm:$0xff] }
  0x2c   : > { %v1428_v21 = vld [vmem:[%s1422_s22] sm:$0xff]  ;;  %v1396_v23 = vmul.f32 %v1395_v19, %v1395_v19  ;;  %v1412_v24 = vsel %vm1375_vm2, %v1411_v20, 0.0  ;;  %v1381_v29 = vsel %vm1380_vm3, 0.0, %v1379_v22 }
  0x2d   : > { %v1429_v25 = vsel %vm1375_vm2, %v1428_v21, 0.0  ;;  %v1413_v26 = vmul.f32 %v1412_v24, %v1412_v24 }
  0x2e   : > { %v1398_v27 = vadd.f32 %v1396_v23, %v1379_v22  ;;  %v1430_v28 = vmul.f32 %v1429_v25, %v1429_v25  ;;  %v1397_v30 = vadd.f32 %v1396_v23, %v1381_v29 }
  0x30   : > { %v1415_v31 = vadd.f32 %v1413_v26, %v1398_v27  ;;  %v1414_v32 = vadd.f32 %v1413_v26, %v1397_v30  ;;  %v1432_v33 = vsel %vm1431_vm4, 0.0, %v1430_v28 }
  0x32   : > { %v1434_v34 = vadd.f32 %v1430_v28, %v1415_v31  ;;  %v1433_v35 = vadd.f32 %v1432_v33, %v1414_v32 }
  0x34   : > { %1435 = vadd.xlane.f32.xlu0 %v1434_v34 }
  0x38   : > { %1443 = vadd.xlane.f32.xlu0 %v1433_v35 }
  0xbd   : > { %v1436_v36 = vpop.xlane.xlu0 %1435 }
  0xbe   : > { %v1437_v37 = vrot.slane %v1436_v36, 4 }
  0xc0   : > { %v1438_v38 = vadd.f32 %v1437_v37, %v1436_v36 }
  0xc1   : > { %v1444_v39 = vpop.xlane.xlu0 %1443 }
  0xc2   : > { %v1439_v40 = vrot.slane %v1438_v38, 2  ;;  %v1445_v41 = vrot.slane %v1444_v39, 4 }
  0xc4   : > { %v1446_v42 = vadd.f32 %v1445_v41, %v1444_v39  ;;  %v1440_v43 = vadd.f32 %v1439_v40, %v1438_v38 }
  0xc6   : > { %v1447_v44 = vrot.slane %v1446_v42, 2  ;;  %v1441_v46 = vrot.slane %v1440_v43, 1 }
  0xc8   : > { %v1448_v45 = vadd.f32 %v1447_v44, %v1446_v42  ;;  %v1442_v49 = vadd.f32 %v1441_v46, %v1440_v43 }
  0xca   : > { %v1449_v47 = vrot.slane %v1448_v45, 1 }
  0xcc   : > { %v1450_v48 = vadd.f32 %v1449_v47, %v1448_v45 }
  0xce   : > { %1536 = vpush %v1450_v48 }
  0xcf   : > { %1538 = vpush %v1442_v49 }
  0xff   : > { %s1537_s29 = spop %1536 }
 0x100   : > { %s1539_s11 = spop %1538 }
 0x101   : > { %s1453_s15 = smul.f32 1e-10, %s1539_s11 }
 0x103   : > { %p1454_p8 = scmp.le.f32.partialorder %s1537_s29, %s1453_s15 }
 0x104   : > { %s1785_s16 = smov (!%p1454_p8), 0  }
 0x105   : > { %1457 = sbr.rel (%p1454_p8) target bundleno = 943 (0x3af), region = 499 }
 0x10a LB: >> { %s1790_s23 = smov 0   ;;  %s1629_s16 = sphi %s1785_s16, %s2009_s16  }
 0x10b LB: >>> { %s458_s24 = smov [#allocation12]  ;;  %v462_v5 = vmov %v1743_v5  ;;  %v465_v6 = vmov %v1745_v6  ;;  %s478_s27 = smov [#allocation13]  ;;  %vm781_vm14 = vcmp.eq.s32.totalorder %v1745_v6, 0  ;;  %vm793_vm15 = vcmp.eq.s32.totalorder %v1745_v6, 7  ;;  %s1633_s23 = sphi %s1790_s23, %s457_s23  }
 0x10c   : >>> { %v482_v5 = vmov %v1743_v5  ;;  %v485_v6 = vmov %v1745_v6  ;;  %v466_v50 = vld [vmem:[%s458_s24] sm:$0xff]  ;;  %vm469_vm5 = vcmp.eq.s32.totalorder %v465_v6, %v462_v5  ;;  %s498_s28 = smov [#allocation15]  ;;  %s459_s21 = smov [#allocation16] }
 0x10d   : >>> { %vm489_vm6 = vcmp.eq.s32.totalorder %v485_v6, %v482_v5  ;;  %v502_v5 = vmov %v1743_v5  ;;  %v505_v6 = vmov %v1745_v6  ;;  %v470_v51 = vsel %vm469_vm5, %v466_v50, 0.0  ;;  %v486_v52 = vld [vmem:[%s478_s27] sm:$0xff]  ;;  %s479_s22 = smov [#allocation17]  ;;  %s499_s29 = smov [#allocation18] }
 0x10e   : >>> { %vm509_vm7 = vcmp.eq.s32.totalorder %v505_v6, %v502_v5  ;;  %v471_v53 = vrot.slane %v470_v51, 4  ;;  %v490_v54 = vsel %vm489_vm6, %v486_v52, 0.0  ;;  %v506_v55 = vld [vmem:[%s498_s28] sm:$0xff]  ;;  %s522_s11 = smov [#allocation17]  ;;  %s520_s15 = smov [#allocation16]  ;;  %v571_v5 = vmov %v1743_v5 }
 0x10f   : >>> { %v491_v56 = vrot.slane %v490_v54, 4  ;;  %v510_v57 = vsel %vm509_vm7, %v506_v55, 0.0  ;;  %s524_s24 = smov [#allocation18]  ;;  %s559_s27 = smov [#allocation19]  ;;  %v574_v6 = vmov %v1745_v6  ;;  %v586_v5 = vmov %v1743_v5 }
 0x110   : >>> { %v472_v58 = vadd.f32 %v471_v53, %v470_v51  ;;  %v511_v59 = vrot.slane %v510_v57, 4  ;;  %s561_s28 = smov [#allocation20]  ;;  %v589_v6 = vmov %v1745_v6  ;;  %vm576_vm12 = vcmp.eq.s32.totalorder %v574_v6, %v571_v5  ;;  %s1812_s14 = smov %s1747_s14 }
 0x111   : >>> { %v492_v60 = vadd.f32 %v491_v56, %v490_v54  ;;  %vm591_vm13 = vcmp.eq.s32.totalorder %v589_v6, %v586_v5  ;;  %s1815_s30 = smov %s1750_s30  ;;  %s1818_s17 = smov %s1753_s17  ;;  %v829_v52 = vld [vmem:[%s1812_s14] sm:$0xff]  ;;  %v684_v5 = vmov %v1743_v5  ;;  %v687_v6 = vmov %v1745_v6 }
 0x112   : >>> { %v473_v61 = vrot.slane %v472_v58, 2  ;;  %v512_v62 = vadd.f32 %v511_v59, %v510_v57  ;;  %s1822_s20 = smov %s1756_s20  ;;  %v830_v53 = vld [vmem:[%s1815_s30] sm:$0xff]  ;;  %s823_s26 = smov [#allocation24]  ;;  %v657_v5 = vmov %v1743_v5  ;;  %v660_v6 = vmov %v1745_v6 }
 0x113   : >>> { %v493_v63 = vrot.slane %v492_v60, 2  ;;  %v831_v56 = vld [vmem:[%s1818_s17] sm:$0xff]  ;;  %v698_v5 = vmov %v1743_v5  ;;  %v701_v6 = vmov %v1745_v6  ;;  %vm691_vm0 = vcmp.eq.s32.totalorder %v687_v6, %v684_v5  ;;  %s457_s23 = sadd.s32 1, %s1633_s23  }
 0x114   : >>> { %v474_v0 = vadd.f32 %v473_v61, %v472_v58  ;;  %v513_v1 = vrot.slane %v512_v62, 2  ;;  %v832_v57 = vld [vmem:[%s1822_s20] sm:$0xff]  ;;  %v671_v5 = vmov %v1743_v5  ;;  %v674_v6 = vmov %v1745_v6  ;;  %p454_p9 = scmp.ge.s32.totalorder %s457_s23, 15  }
 0x115   : >>> { %v494_v2 = vadd.f32 %v493_v63, %v492_v60  ;;  %vm665_vm1 = vcmp.eq.s32.totalorder %v660_v6, %v657_v5  ;;  %vm706_vm3 = vcmp.eq.s32.totalorder %v701_v6, %v698_v5  ;;  %vm678_vm4 = vcmp.eq.s32.totalorder %v674_v6, %v671_v5 }
 0x116   : >>> { %v475_v3 = vrot.slane %v474_v0, 1  ;;  %v514_v4 = vadd.f32 %v513_v1, %v512_v62  ;;  %vm720_vm5 = vcmp.eq.s32.totalorder %v1743_v5, 0  ;;  %vm724_vm6 = vcmp.eq.s32.totalorder %v1743_v5, 1 }
 0x117   : >>> { %v495_v7 = vrot.slane %v494_v2, 1  ;;  %vm737_vm7 = vcmp.eq.s32.totalorder %v1743_v5, 7  ;;  %v358_v5 = vmov (%p454_p9), %v1743_v5  ;;  %v361_v6 = vmov (%p454_p9), %v1745_v6 }
 0x118   : >>> { %v476_v8 = vadd.f32 %v475_v3, %v474_v0  ;;  %v515_v9 = vrot.slane %v514_v4, 1  ;;  %v411_v5 = vmov (%p454_p9), %v1743_v5 }
 0x119   : >>> { %v496_v10 = vadd.f32 %v495_v7, %v494_v2 }
 0x11a   : >>> { %477 = vst [vmem:[%s459_s21] sm:$0x1] %v476_v8  ;;  %v516_v11 = vadd.f32 %v515_v9, %v514_v4  ;;  %s518_s21 = smov [#allocation21] }
 0x11b   : >>> { %497 = vst [vmem:[%s479_s22] sm:$0x1] %v496_v10  ;;  %s519_s22 = smov [#allocation22]  ;;  %s563_s21 = smov %s518_s21 }
 0x11c   : >>> { %517 = vst [vmem:[%s499_s29] sm:$0x1] %v516_v11  ;;  %s565_s22 = smov %s519_s22  ;;  %s567_s29 = smov [#allocation21] }
 0x121   : >>> { %v521_v14 = vld [vmem:[%s520_s15] sm:$0xff]  ;;  %s580_s15 = smov [#allocation23] }
 0x122   : >>> { %v523_v12 = vld [vmem:[%s522_s11] sm:$0xff]  ;;  %v544_v29 = vand.u32 2147483647, %v521_v14  ;;  %s582_s11 = smov [#allocation22] }
 0x123   : >>> { %v527_v13 = vmul.f32 2.0, %v523_v12  ;;  %v525_v15 = vld [vmem:[%s524_s24] sm:$0xff]  ;;  %v545_v32 = vand.u32 2147483647, %v523_v12  ;;  %s597_s24 = smov [#allocation23] }
 0x124   : >>> { %v526_v16 = vsub.f32 %v525_v15, %v521_v14  ;;  %v546_v30 = vand.u32 2147483647, %v525_v15 }
 0x125   : >>> { %1587 = vrcp.f32 %v527_v13 }
 0x126   : >>> { %v547_v31 = vmin.f32 %v544_v29, %v546_v30 }
 0x128   : >>> { %v548_v33 = vmul.f32 1.1920929e-08, %v547_v31 }
 0x12a   : >>> { %vm549_vm11 = vcmp.le.f32.partialorder %v545_v32, %v548_v33 }
 0x132   : >>> { %v1588_v17 = vpop.eup %1587 }
 0x133   : >>> { %v529_v18 = vmul.f32 %v1588_v17, %v526_v16 }
 0x135   : >>> { %v531_v19 = vmul.f32 %v529_v18, %v529_v18  ;;  %vm530_vm10 = vcmp.ge.f32.partialorder %v529_v18, 0.0 }
 0x137   : >>> { %v532_v20 = vadd.f32 1.0, %v531_v19 }
 0x139   : >>> { %1589 = vrsqrt.f32 %v532_v20  ;;  %vm535_vm8 = vcmp.eq.f32.partialorder %v532_v20, inf  ;;  %v538_v22 = vand.u32 2147483648, %v532_v20  ;;  %vm537_vm9 = vcmp.eq.f32.partialorder %v532_v20, 0.0 }
 0x146   : >>> { %v1590_v21 = vpop.eup %1589 }
 0x147   : >>> { %v534_v23 = vmul.f32 %v1590_v21, %v532_v20 }
 0x149   : >>> { %v536_v24 = vsel %vm535_vm8, %v532_v20, %v534_v23  ;;  %vm373_vm8 = vcmp.eq.s32.totalorder (%p454_p9), %v361_v6, %v358_v5  ;;  %v414_v6 = vmov (%p454_p9), %v1745_v6  ;;  %v377_v5 = vmov (%p454_p9), %v1743_v5 }
 0x14a   : >>> { %v539_v25 = vsel %vm537_vm9, %v538_v22, %v536_v24  ;;  %v380_v6 = vmov (%p454_p9), %v1745_v6  ;;  %v394_v5 = vmov (%p454_p9), %v1743_v5  ;;  %vm426_vm9 = vcmp.eq.s32.totalorder (%p454_p9), %v414_v6, %v411_v5 }
 0x14b   : >>> { %v540_v26 = vxor.u32 2147483648, %v539_v25  ;;  %v397_v6 = vmov (%p454_p9), %v1745_v6 }
 0x14d   : >>> { %v541_v27 = vsel %vm530_vm10, %v539_v25, %v540_v26 }
 0x14e   : >>> { %v542_v28 = vadd.f32 %v541_v27, %v529_v18 }
 0x150   : >>> { %1591 = vrcp.f32 %v542_v28 }
 0x15d   : >>> { %v1592_v34 = vpop.eup %1591 }
 0x15e   : >>> { %v550_v35 = vsel %vm549_vm11, 0.0, %v1592_v34 }
 0x15f   : >>> { %v551_v36 = vmul.f32 %v550_v35, %v550_v35  ;;  %v555_v37 = vmul.f32 %v550_v35, %v523_v12 }
 0x161   : >>> { %v552_v38 = vadd.f32 1.0, %v551_v36  ;;  %v556_v39 = vsub.f32 %v521_v14, %v555_v37  ;;  %v558_v40 = vadd.f32 %v555_v37, %v525_v15 }
 0x163   : >>> { %1593 = vrsqrt.f32 %v552_v38  ;;  %560 = vst [vmem:[%s559_s27] sm:$0xff] %v556_v39  ;;  %562 = vst [vmem:[%s561_s28] sm:$0xff] %v558_v40  ;;  %s1805_s27 = smov [#allocation12]  ;;  %s595_s28 = smov [#allocation24] }
 0x164   : >>> { %v605_v49 = vld [vmem:[%s1805_s27] sm:$0xff] }
 0x170   : >>> { %v1594_v41 = vpop.eup %1593 }
 0x171   : >>> { %564 = vst [vmem:[%s563_s21] sm:$0xff] %v1594_v41  ;;  %v554_v42 = vmul.f32 %v1594_v41, %v550_v35  ;;  %s1807_s21 = smov [#allocation13] }
 0x172   : >>> { %v606_v50 = vld [vmem:[%s1807_s21] sm:$0xff] }
 0x173   : >>> { %566 = vst [vmem:[%s565_s22] sm:$0xff] %v554_v42  ;;  %s1809_s22 = smov [#allocation15] }
 0x174   : >>> { %v608_v51 = vld [vmem:[%s1809_s22] sm:$0xff] }
 0x178   : >>> { %v568_v43 = vld [vmem:[%s567_s29] ss:$0 sm:$0xff]  ;;  %s821_s29 = smov [#allocation23] }
 0x179   : >>> { %v577_v44 = vsel %vm576_vm12, %v568_v43, 0.0 }
 0x17a   : >>> { %578 = vadd.xlane.f32.xlu0 %v577_v44  ;;  %v583_v45 = vld [vmem:[%s582_s11] ss:$0 sm:$0xff]  ;;  %s1824_s11 = smov [#allocation14] }
 0x17b   : >>> { %v592_v46 = vsel %vm591_vm13, %v583_v45, 0.0  ;;  %v607_v58 = vld [vmem:[%s1824_s11] sm:$0xff] }
 0x17e   : >>> { %593 = vadd.xlane.f32.xlu0 %v592_v46 }
 0x203   : >>> { %v579_v47 = vpop.xlane.xlu0 %578 }
 0x204   : >>> { %581 = vst [vmem:[%s580_s15] sm:$0xff] %v579_v47  ;;  %s599_s15 = smov [#allocation24] }
 0x207   : >>> { %v594_v48 = vpop.xlane.xlu0 %593 }
 0x208   : >>> { %596 = vst [vmem:[%s595_s28] sm:$0xff] %v594_v48  ;;  %s1851_s28 = smov [#allocation14] }
 0x20b   : >>> { %v598_v54 = vld [vmem:[%s597_s24] sm:$0xff]  ;;  %s627_s24 = smov [#allocation22] }
 0x20c   : >>> { %v822_v55 = vld [vmem:[%s821_s29] sm:$0xff]  ;;  %v609_v59 = vmul.f32 %v605_v49, %v598_v54  ;;  %v612_v60 = vmul.f32 %v606_v50, %v598_v54  ;;  %v619_v61 = vmul.f32 %v608_v51, %v598_v54  ;;  %v616_v4 = vmul.f32 %v607_v58, %v598_v54  ;;  %s654_s29 = smov [#allocation19] }
 0x20d   : >>> { %v833_v62 = vmul.f32 %v829_v52, %v822_v55  ;;  %v836_v63 = vmul.f32 %v830_v53, %v822_v55  ;;  %v840_v0 = vmul.f32 %v831_v56, %v822_v55  ;;  %v843_v1 = vmul.f32 %v832_v57, %v822_v55  ;;  %v628_v24 = vld [vmem:[%s627_s24] ss:$0 sm:$0xff]  ;;  %s694_s24 = smov [#allocation15] }
 0x20e   : >>> { %v661_v55 = vld [vmem:[%s654_s29] ss:$0 sm:$0xff]  ;;  %s710_s29 = smov [#allocation13] }
 0x20f   : >>> { %v600_v2 = vld [vmem:[%s599_s15] sm:$0xff]  ;;  %s681_s15 = smov [#allocation14] }
 0x210   : >>> { %v824_v3 = vld [vmem:[%s823_s26] sm:$0xff]  ;;  %v613_v7 = vmul.f32 %v608_v51, %v600_v2  ;;  %v615_v8 = vmul.f32 %v605_v49, %v600_v2  ;;  %v618_v9 = vmul.f32 %v606_v50, %v600_v2  ;;  %v610_v14 = vmul.f32 %v607_v58, %v600_v2  ;;  %s625_s26 = smov [#allocation21] }
 0x211   : >>> { %v834_v10 = vmul.f32 %v831_v56, %v824_v3  ;;  %v837_v11 = vmul.f32 %v832_v57, %v824_v3  ;;  %v839_v12 = vmul.f32 %v829_v52, %v824_v3  ;;  %v842_v13 = vmul.f32 %v830_v53, %v824_v3  ;;  %v626_v23 = vld [vmem:[%s625_s26] ss:$0 sm:$0xff]  ;;  %s653_s26 = smov [#allocation12] }
 0x212   : >>> { %v614_v15 = vsub.f32 %v612_v60, %v613_v7  ;;  %v620_v16 = vadd.f32 %v619_v61, %v618_v9  ;;  %v617_v18 = vadd.f32 %v616_v4, %v615_v8  ;;  %v611_v22 = vsub.f32 %v609_v59, %v610_v14 }
 0x213   : >>> { %v835_v17 = vsub.f32 %v833_v62, %v834_v10  ;;  %v838_v19 = vsub.f32 %v836_v63, %v837_v11  ;;  %v841_v20 = vadd.f32 %v840_v0, %v839_v12  ;;  %v844_v21 = vadd.f32 %v843_v1, %v842_v13 }
 0x214   : >>> { %622 = vst [vmem:[%s1807_s21] sm:$0xff] %v614_v15  ;;  %624 = vst [vmem:[%s1809_s22] sm:$0xff] %v620_v16  ;;  %s1853_s21 = smov [#allocation15]  ;;  %s1857_s22 = smov [#allocation13] }
 0x215   : >>> { %845 = vst [vmem:[%s1812_s14] sm:$0xff] %v835_v17  ;;  %623 = vst [vmem:[%s1824_s11] sm:$0xff] %v617_v18  ;;  %s849_s14 = smov %s1747_s14  ;;  %s695_s11 = smov [#allocation20] }
 0x216   : >>> { %846 = vst [vmem:[%s1815_s30] sm:$0xff] %v838_v19  ;;  %847 = vst [vmem:[%s1818_s17] sm:$0xff] %v841_v20  ;;  %s850_s17 = smov %s1753_s17  ;;  %s1844_s30 = smov %s1750_s30  ;;  %v702_v56 = vld [vmem:[%s695_s11] ss:$0 sm:$0xff] }
 0x217   : >>> { %848 = vst [vmem:[%s1822_s20] sm:$0xff] %v844_v21  ;;  %621 = vst [vmem:[%s1805_s27] sm:$0xff] %v611_v22  ;;  %s1847_s20 = smov %s1756_s20  ;;  %s1855_s27 = smov [#allocation12] }
 0x218   : >>> { %s1637_s11 = smov 127  }
 0x21b   : >>> { %v636_v39 = vld [vmem:[%s1853_s21] sm:$0xff] }
 0x21c   : >>> { %v851_v25 = vld [vmem:[%s849_s14] ss:$0 sm:$0xff]  ;;  %v1515_v27 = vld [vmem:[%s849_s14 + $0x7] ss:$0 sm:$0xff]  ;;  %v644_v42 = vmul.f32 %v636_v39, %v628_v24  ;;  %v647_v46 = vmul.f32 %v636_v39, %v626_v23 }
 0x21d   : >>> { %v1514_v26 = vld [vmem:[%s849_s14 - $0x1] sm:$0xfe]  ;;  %v1519_v34 = vld [vmem:[%s1844_s30 + $0x7] ss:$0 sm:$0xff] }
 0x21e   : >>> { %v858_v28 = vsel %vm781_vm14, %v851_v25, %v1514_v26  ;;  %v862_v29 = vld [vmem:[%s850_s17] ss:$0 sm:$0xff]  ;;  %v1517_v30 = vld [vmem:[%s850_s17 + $0x1] sm:$0x7f] }
 0x21f   : >>> { %v875_v31 = vld [vmem:[%s1844_s30] ss:$0 sm:$0xff]  ;;  %861 = vst [vmem:[%s849_s14] sm:$0xff] %v858_v28  ;;  %v870_v32 = vsel %vm793_vm15, %v1515_v27, %v1517_v30  ;;  %v1521_v37 = vld [vmem:[%s1847_s20 + $0x1] sm:$0x7f] }
 0x220   : >>> { %v1518_v33 = vld [vmem:[%s1844_s30 - $0x1] sm:$0xfe]  ;;  %1516 = vst [vmem:[%s849_s14 + $0x1] sm:$0x1] %v862_v29  ;;  %872 = vst [vmem:[%s850_s17] sm:$0xff] %v870_v32  ;;  %v894_v40 = vsel %vm793_vm15, %v1519_v34, %v1521_v37 }
 0x221   : >>> { %v886_v35 = vld [vmem:[%s1847_s20] ss:$0 sm:$0xff]  ;;  %v882_v36 = vsel %vm781_vm14, %v875_v31, %v1518_v33 }
 0x222   : >>> { %v635_v38 = vld [vmem:[%s1851_s28] sm:$0xff]  ;;  %885 = vst [vmem:[%s1844_s30] sm:$0xff] %v882_v36  ;;  %896 = vst [vmem:[%s1847_s20] sm:$0xff] %v894_v40 }
 0x223   : >>> { %v643_v41 = vmul.f32 %v635_v38, %v626_v23  ;;  %v646_v43 = vmul.f32 %v635_v38, %v628_v24  ;;  %v633_v44 = vld [vmem:[%s1855_s27] sm:$0xff]  ;;  %1520 = vst [vmem:[%s1844_s30 + $0x1] sm:$0x1] %v886_v35 }
 0x224   : >>> { %v634_v45 = vld [vmem:[%s1857_s22] sm:$0xff]  ;;  %v637_v47 = vmul.f32 %v633_v44, %v626_v23  ;;  %v640_v49 = vmul.f32 %v633_v44, %v628_v24 }
 0x225   : >>> { %v638_v48 = vmul.f32 %v634_v45, %v628_v24  ;;  %v645_v50 = vsub.f32 %v643_v41, %v644_v42  ;;  %v641_v51 = vmul.f32 %v634_v45, %v626_v23  ;;  %v648_v52 = vadd.f32 %v647_v46, %v646_v43 }
 0x227   : >>> { %v639_v53 = vsub.f32 %v637_v47, %v638_v48  ;;  %651 = vst [vmem:[%s1851_s28] sm:$0xff] %v645_v50  ;;  %v642_v54 = vadd.f32 %v641_v51, %v640_v49  ;;  %652 = vst [vmem:[%s1853_s21] sm:$0xff] %v648_v52  ;;  %s668_s28 = smov [#allocation13]  ;;  %s1891_s21 = smov [#allocation14] }
 0x229   : >>> { %649 = vst [vmem:[%s1855_s27] sm:$0xff] %v639_v53  ;;  %650 = vst [vmem:[%s1857_s22] sm:$0xff] %v642_v54  ;;  %s709_s27 = smov [#allocation12]  ;;  %s1636_s22 = smov 1  }
 0x22e   : >>> { %v688_v57 = vld [vmem:[%s681_s15] sm:$0xff] }
 0x22f   : >>> { %v692_v58 = vsel %vm691_vm0, 0.0, %v688_v57  ;;  %v703_v60 = vld [vmem:[%s694_s24] sm:$0xff] }
 0x230   : >>> { %v662_v59 = vld [vmem:[%s653_s26] sm:$0xff]  ;;  %693 = vst [vmem:[%s681_s15] sm:$0xff] %v692_v58  ;;  %v707_v63 = vsel %vm706_vm3, %v702_v56, %v703_v60  ;;  %s1894_s15 = smov [#allocation15] }
 0x231   : >>> { %v666_v61 = vsel %vm665_vm1, %v661_v55, %v662_v59  ;;  %v675_v62 = vld [vmem:[%s668_s28] sm:$0xff]  ;;  %708 = vst [vmem:[%s694_s24] sm:$0xff] %v707_v63  ;;  %s797_s24 = smov [#allocation13] }
 0x232   : >>> { %667 = vst [vmem:[%s653_s26] sm:$0xff] %v666_v61  ;;  %v679_v0 = vsel %vm678_vm4, 0.0, %v675_v62  ;;  %s773_s26 = smov [#allocation12] }
 0x233   : >>> { %680 = vst [vmem:[%s668_s28] sm:$0xff] %v679_v0  ;;  %s774_s28 = smov [#allocation14] }
 0x237   : >>> { %v747_v1 = vld [vmem:[%s1891_s21] sm:$0xff] }
 0x238   : >>> { %748 = vrot.lane.b32.xlu0 %v747_v1, %s1636_s22  ;;  %v743_v4 = vld [vmem:[%s1894_s15] sm:$0xff] }
 0x239   : >>> { %v715_v2 = vld [vmem:[%s709_s27] sm:$0xff] }
 0x23a   : >>> { %716 = vrot.lane.b32.xlu1 %v715_v2, %s1636_s22  ;;  %v711_v3 = vld [vmem:[%s710_s29] sm:$0xff] }
 0x23e   : >>> { %712 = vrot.lane.b32.xlu1 %v711_v3, %s1636_s22 }
 0x242   : >>> { %733 = vrot.lane.b32.xlu1 %v711_v3, %s1637_s11 }
 0x246   : >>> { %744 = vrot.lane.b32.xlu1 %v743_v4, %s1636_s22  ;;  %s362_s22 = smov (%p454_p9), [#allocation12] }
 0x24a   : >>> { %765 = vrot.lane.b32.xlu1 %v743_v4, %s1637_s11  ;;  %s398_s11 = smov (%p454_p9), [#allocation14] }
 0x2aa   : >>> { %v749_v13 = vpop.permute.xlu0 %748 }
 0x2ab   : >>> { %v753_v15 = vsel %vm720_vm5, %v747_v1, %v749_v13 }
 0x2ac   : >>> { %v717_v7 = vpop.permute.xlu1 %716 }
 0x2ad   : >>> { %v721_v8 = vsel %vm720_vm5, %v715_v2, %v717_v7 }
 0x2b0   : >>> { %v713_v9 = vpop.permute.xlu1 %712 }
 0x2b1   : >>> { %v725_v10 = vsel %vm724_vm6, %v713_v9, %v721_v8 }
 0x2b2   : >>> { %v731_v11 = vsel %vm1375_vm2, %v725_v10, 0.0 }
 0x2b3   : >>> { %739 = vst [vmem:[%s709_s27] sm:$0xff] %v731_v11  ;;  %s798_s27 = smov [#allocation15] }
 0x2b4   : >>> { %v734_v12 = vpop.permute.xlu1 %733 }
 0x2b5   : >>> { %v738_v14 = vsel %vm737_vm7, %v715_v2, %v734_v12 }
 0x2b6   : >>> { %740 = vst [vmem:[%s710_s29] sm:$0xff] %v738_v14  ;;  %s381_s29 = smov (%p454_p9), [#allocation13] }
 0x2b8   : >>> { %v745_v16 = vpop.permute.xlu1 %744 }
 0x2b9   : >>> { %v757_v17 = vsel %vm724_vm6, %v745_v16, %v753_v15 }
 0x2ba   : >>> { %v775_v18 = vld [vmem:[%s773_s26] ss:$0 sm:$0xff]  ;;  %v1507_v20 = vld [vmem:[%s773_s26 + $0x7] ss:$0 sm:$0xff]  ;;  %v763_v22 = vsel %vm1375_vm2, %v757_v17, 0.0 }
 0x2bb   : >>> { %v1506_v19 = vld [vmem:[%s773_s26 - $0x1] sm:$0xfe]  ;;  %771 = vst [vmem:[%s1891_s21] sm:$0xff] %v763_v22  ;;  %s897_s21 = sadd.s32 (%p454_p9), 1, %s1629_s16  }
 0x2bc   : >>> { %v782_v21 = vsel %vm781_vm14, %v775_v18, %v1506_v19  ;;  %v766_v23 = vpop.permute.xlu1 %765  ;;  %p450_p10 = scmp.ge.s32.totalorder (%p454_p9), %s897_s21, 15  ;;  %s2009_s16 = smov (%p454_p9), %s897_s21 }
 0x2bd   : >>> { %785 = vst [vmem:[%s773_s26] sm:$0xff] %v782_v21  ;;  %v799_v24 = vld [vmem:[%s797_s24] ss:$0 sm:$0xff]  ;;  %v1511_v26 = vld [vmem:[%s797_s24 + $0x7] ss:$0 sm:$0xff]  ;;  %v770_v27 = vsel %vm737_vm7, %v747_v1, %v766_v23 }
 0x2be   : >>> { %v1510_v25 = vld [vmem:[%s797_s24 - $0x1] sm:$0xfe]  ;;  %772 = vst [vmem:[%s1894_s15] sm:$0xff] %v770_v27  ;;  %s415_s15 = smov (%p454_p9), [#allocation15] }
 0x2bf   : >>> { %v806_v28 = vsel %vm781_vm14, %v799_v24, %v1510_v25 }
 0x2c0   : >>> { %809 = vst [vmem:[%s797_s24] sm:$0xff] %v806_v28 }
 0x2c2   : >>> { %v786_v29 = vld [vmem:[%s774_s28] ss:$0 sm:$0xff]  ;;  %v1509_v30 = vld [vmem:[%s774_s28 + $0x1] sm:$0x7f] }
 0x2c3   : >>> { %1508 = vst [vmem:[%s773_s26 + $0x1] sm:$0x1] %v786_v29  ;;  %v794_v31 = vsel %vm793_vm15, %v1507_v20, %v1509_v30 }
 0x2c4   : >>> { %796 = vst [vmem:[%s774_s28] sm:$0xff] %v794_v31 }
 0x2c5   : >>> { %v810_v32 = vld [vmem:[%s798_s27] ss:$0 sm:$0xff]  ;;  %v1513_v33 = vld [vmem:[%s798_s27 + $0x1] sm:$0x7f] }
 0x2c6   : >>> { %1512 = vst [vmem:[%s797_s24 + $0x1] sm:$0x1] %v810_v32  ;;  %v818_v34 = vsel %vm793_vm15, %v1511_v26, %v1513_v33 }
 0x2c7   : >>> { %820 = vst [vmem:[%s798_s27] sm:$0xff] %v818_v34  ;;  %456 = sbr.rel (!%p454_p9) target bundleno = 267 (0x10b), region = 494 }
 0x2ca   : >> { %v368_v35 = vld [vmem:[%s362_s22] sm:$0xff] (%p454_p9) }
 0x2cb   : >> { %v369_v37 = vsel (%p454_p9), %vm1375_vm2, %v368_v35, 0.0  ;;  %v404_v39 = vld [vmem:[%s398_s11] sm:$0xff] (%p454_p9) }
 0x2cc   : >> { %v370_v41 = vmul.f32 %v369_v37, %v369_v37  ;;  %v405_v43 = vsel %vm1375_vm2, %v404_v39, 0.0 }
 0x2cd   : >> { %v387_v36 = vld [vmem:[%s381_s29] sm:$0xff]  ;;  %v406_v45 = vmul.f32 %v405_v43, %v405_v43 }
 0x2ce   : >> { %v388_v38 = vsel %vm1375_vm2, %v387_v36, 0.0  ;;  %v421_v40 = vld [vmem:[%s415_s15] sm:$0xff]  ;;  %v374_v48 = vsel %vm373_vm8, 0.0, %v370_v41 }
 0x2cf   : >> { %v389_v42 = vmul.f32 %v388_v38, %v388_v38  ;;  %v422_v44 = vsel %vm1375_vm2, %v421_v40, 0.0 }
 0x2d0   : >> { %v423_v47 = vmul.f32 %v422_v44, %v422_v44 }
 0x2d1   : >> { %v391_v46 = vadd.f32 %v389_v42, %v370_v41  ;;  %v390_v49 = vadd.f32 %v389_v42, %v374_v48 }
 0x2d2   : >> { %v427_v52 = vsel %vm426_vm9, 0.0, %v423_v47 }
 0x2d3   : >> { %v408_v50 = vadd.f32 %v406_v45, %v391_v46  ;;  %v407_v51 = vadd.f32 %v406_v45, %v390_v49 }
 0x2d5   : >> { %v429_v53 = vadd.f32 %v423_v47, %v408_v50  ;;  %v428_v54 = vadd.f32 %v427_v52, %v407_v51 }
 0x2d7   : >> { %430 = vadd.xlane.f32.xlu0 %v429_v53 }
 0x2db   : >> { %438 = vadd.xlane.f32.xlu0 %v428_v54 }
 0x360   : >> { %v431_v55 = vpop.xlane.xlu0 %430 }
 0x361   : >> { %v432_v56 = vrot.slane %v431_v55, 4 }
 0x363   : >> { %v433_v57 = vadd.f32 %v432_v56, %v431_v55 }
 0x364   : >> { %v439_v58 = vpop.xlane.xlu0 %438 }
 0x365   : >> { %v434_v59 = vrot.slane %v433_v57, 2  ;;  %v440_v60 = vrot.slane %v439_v58, 4 }
 0x367   : >> { %v441_v61 = vadd.f32 %v440_v60, %v439_v58  ;;  %v435_v62 = vadd.f32 %v434_v59, %v433_v57 }
 0x369   : >> { %v442_v63 = vrot.slane %v441_v61, 2  ;;  %v436_v1 = vrot.slane %v435_v62, 1 }
 0x36b   : >> { %v443_v0 = vadd.f32 %v442_v63, %v441_v61  ;;  %v437_v4 = vadd.f32 %v436_v1, %v435_v62 }
 0x36d   : >> { %v444_v2 = vrot.slane %v443_v0, 1 }
 0x36f   : >> { %v445_v3 = vadd.f32 %v444_v2, %v443_v0 }
 0x371   : >> { %1540 = vpush %v445_v3 }
 0x372   : >> { %1542 = vpush %v437_v4 }
 0x3a2   : >> { %s1541_s23 = spop %1540 }
 0x3a3   : >> { %s1543_s26 = spop %1542 }
 0x3a4   : >> { %s448_s24 = smul.f32 1e-10, %s1543_s26 }
 0x3a6   : >> { %p449_p11 = scmp.le.f32.partialorder %s1541_s23, %s448_s24 }
 0x3a8   : >> { %p451_p12 = por %p450_p10, %p449_p11 }
 0x3aa   : > { %899 = sbr.rel (!%p451_p12) target bundleno = 266 (0x10a), region = 505 }
 0x3af PF: > { %s904_s28 = smov [#allocation12]  ;;  %v908_v5 = vmov %v1743_v5  ;;  %v911_v6 = vmov %v1745_v6  ;;  %s924_s27 = smov [#allocation15] }
 0x3b0   : > { %v928_v5 = vmov %v1743_v5  ;;  %v931_v6 = vmov %v1745_v6  ;;  %v912_v7 = vld [vmem:[%s904_s28] sm:$0xff]  ;;  %vm915_vm10 = vcmp.eq.s32.totalorder %v911_v6, %v908_v5  ;;  %s900_s16 = sand.u32 7, %s1704_s12   ;;  %s2010_s29 = scalar_lea.vmem [#allocation7], %s1741_s18 }
 0x3b1   : > { %vm935_vm11 = vcmp.eq.s32.totalorder %v931_v6, %v928_v5  ;;  %v916_v8 = vsel %vm915_vm10, %v912_v7, 0.0  ;;  %v932_v10 = vld [vmem:[%s924_s27] sm:$0xff]  ;;  %s901_s21 = scalar_lea.vmem [#allocation4], %s900_s16  ;;  %s903_s22 = scalar_lea.vmem [#allocation6], %s900_s16 }
 0x3b2   : > { %v917_v9 = vrot.slane %v916_v8, 4  ;;  %v936_v11 = vsel %vm935_vm11, %v932_v10, 0.0  ;;  %s905_s21 = smov %s901_s21  ;;  %s925_s22 = smov %s903_s22 }
 0x3b3   : > { %v937_v13 = vrot.slane %v936_v11, 4  ;;  %s987_s11 = sshrl.u32 (%p1718_p3), %s1704_s12, 3 }
 0x3b4   : > { %v918_v12 = vadd.f32 %v917_v9, %v916_v8  ;;  %s1528_s15 = sshll.u32 (%p1718_p3), %s987_s11, 2 }
 0x3b5   : > { %v938_v15 = vadd.f32 %v937_v13, %v936_v11  ;;  %s989_s24 = scalar_lea.vmem (%p1718_p3), %s2001_s4, %s1528_s15 }
 0x3b6   : > { %v919_v14 = vrot.slane %v918_v12, 2 }
 0x3b7   : > { %v939_v17 = vrot.slane %v938_v15, 2 }
 0x3b8   : > { %v920_v16 = vadd.f32 %v919_v14, %v918_v12 }
 0x3b9   : > { %v940_v19 = vadd.f32 %v939_v17, %v938_v15 }
 0x3ba   : > { %v921_v18 = vrot.slane %v920_v16, 1 }
 0x3bb   : > { %v941_v5 = vrot.slane %v940_v19, 1 }
 0x3bc   : > { %v922_v20 = vadd.f32 %v921_v18, %v920_v16 }
 0x3bd   : > { %v942_v6 = vadd.f32 %v941_v5, %v940_v19 }
 0x3be   : > { %923 = vst [vmem:[%s905_s21] sm:$0x1] %v922_v20 }
 0x3bf   : > { %943 = vst [vmem:[%s925_s22] sm:$0x1] %v942_v6 }
 0x3c3   : > { %986 = sbr.rel (!%p1718_p3) target bundleno = 975 (0x3cf), region = 174 }
 0x3c5   : > { %v948_v21 = vld [vmem:[#allocation4] sm:$0xf] }
 0x3c6   : > { %951 = vst [vmem:[%s287_s25] sm:$0xf] %v948_v21  ;;  %v956_v22 = vld [vmem:[#allocation6] sm:$0xf] }
 0x3c7   : > { %959 = vst [vmem:[%s2010_s29] sm:$0xf] %v956_v22 }
 0x3cd   : > { %v1006_v23 = vld [vmem:[%s287_s25] sm:$0xf] }
 0x3ce   : > { %1007 = vst [vmem:[%s989_s24] sm:$0xf] %v1006_v23 }
 0x3cf PF: > { %1025 = sbr.rel (!%p1718_p3) target bundleno = 983 (0x3d7), region = 208  ;;  %s1026_s28 = sshrl.u32 (%p1718_p3), %s1704_s12, 3 }
 0x3d0   : > { %s2011_s27 = scalar_lea.vmem (%p1718_p3), [#allocation7], %s1741_s18  ;;  %s1529_s16 = sshll.u32 (%p1718_p3), %s1026_s28, 2 }
 0x3d1   : > { %s1028_s25 = scalar_lea.vmem (%p1718_p3), %s2002_s5, %s1529_s16 }
 0x3d5   : > { %v1045_v24 = vld [vmem:[%s2011_s27] sm:$0xf] }
 0x3d6   : > { %1046 = vst [vmem:[%s1028_s25] sm:$0xf] %v1045_v24 }
 0x3d7 PF: > { %s1530_s29 = sshll.u32 %s1704_s12, 3  ;;  %v1092_v25 = vld [vmem:[%s1747_s14] sm:$0xff]  ;;  %v1127_v26 = vld [vmem:[%s1750_s30] sm:$0xff] }
 0x3d8   : > { %v1162_v27 = vld [vmem:[%s1753_s17] sm:$0xff]  ;;  %s1063_s18 = scalar_lea.vmem %s2003_s6, %s1530_s29  ;;  %s1098_s26 = scalar_lea.vmem %s2004_s7, %s1530_s29  ;;  %v1197_v28 = vld [vmem:[%s1756_s20] sm:$0xff] }
 0x3d9   : > { %1093 = vst [vmem:[%s1063_s18] sm:$0xff] %v1092_v25  ;;  %1128 = vst [vmem:[%s1098_s26] sm:$0xff] %v1127_v26  ;;  %s1133_s27 = scalar_lea.vmem %s2005_s8, %s1530_s29  ;;  %s1168_s14 = scalar_lea.vmem %s2006_s9, %s1530_s29 }
 0x3da   : > { %1163 = vst [vmem:[%s1133_s27] sm:$0xff] %v1162_v27  ;;  %1198 = vst [vmem:[%s1168_s14] sm:$0xff] %v1197_v28 }
 0x3db PF: > { %s2012_s17 = sld [smem:[#allocation25_spill]]  ;;  %p13_p13 = scmp.ge.s32.totalorder %s1707_s13, 6  }
 0x3dc   : > { %s2013_s30 = smov %s1621_s10  ;;  %s2015_s11 = smov %s1707_s13 }
 0x3dd   :  { %15 = sbr.rel (!%p13_p13) target bundleno = 2 (0x2), region = 516 }
 0x3e1   : > { %s2014_s10 = smov %s2012_s17 }

// kernel: spd_tangent_space.1
= control target key start
LH: loop header
LB: loop body
LE: loop exit
PB: predicated region body
PF: predicated region fallthrough
CT: control target
= control target key end

     0   :  { %vm67_vm0 = vcmask 130048   ;;  %v39_v14 = vlaneseq  ;;  %s603_s0 = inlined_call_operand.vmem [shape: f32[4,16,16], index: 0, kind: input, shape index: {}]   ;;  %s604_s1 = inlined_call_operand.vmem [shape: f32[4,1,16], index: 1, kind: input, shape index: {}]   ;;  %s605_s2 = inlined_call_operand.vmem [shape: f32[4,16,16], index: 2, kind: output, shape index: {}]  }
   0x1   :  { %v12_v0 = vld [vmem:[%s603_s0 + $0x8] sm:$0xff]  ;;  %v14_v1 = vld [vmem:[%s603_s0 + $0x18] sm:$0xff]  ;;  %v11_v2 = vld [vmem:[%s603_s0] sm:$0xff] }
   0x2   :  { %460 = vmatprep.subr.msk.mxu0 %vm67_vm0, %v12_v0  ;;  %467 = vmatprep.subr.msk.mxu1 %vm67_vm0, %v14_v1  ;;  %v13_v3 = vld [vmem:[%s603_s0 + $0x10] sm:$0xff]  ;;  %v19_v4 = vld [vmem:[%s604_s1] sm:$0x1]  ;;  %v20_v5 = vld [vmem:[%s604_s1 + $0x1] sm:$0x1]  ;;  %v40_v15 = vshrl.u32 %v39_v14, 7 }
   0x3   :  { %461 = vmatpush3.xpose.msk.msra.mxu0 %vm67_vm0, %v12_v0  ;;  %468 = vmatpush3.xpose.msk.msra.mxu1 %vm67_vm0, %v14_v1  ;;  %v23_v6 = vmax.f32 %v19_v4, 1.1754944e-38  ;;  %v24_v7 = vmax.f32 %v20_v5, 1.1754944e-38  ;;  %v21_v8 = vld [vmem:[%s604_s1 + $0x2] sm:$0x1]  ;;  %v22_v10 = vld [vmem:[%s604_s1 + $0x3] sm:$0x1] }
   0x4   :  { %462 = vmatprep.subr.msk.mxu0 %vm67_vm0, %v11_v2  ;;  %469 = vmatprep.subr.msk.mxu1 %vm67_vm0, %v13_v3  ;;  %v25_v9 = vmax.f32 %v21_v8, 1.1754944e-38  ;;  %v16_v11 = vld [vmem:[%s603_s0 + $0x28] sm:$0xff]  ;;  %v18_v12 = vld [vmem:[%s603_s0 + $0x38] sm:$0xff]  ;;  %v26_v13 = vmax.f32 %v22_v10, 1.1754944e-38  ;;  %v41_v16 = vsub.s32 0, %v40_v15  ;;  %v15_v27 = vld [vmem:[%s603_s0 + $0x20] sm:$0xff] }
   0x5   :  { %488 = vlog2.f32 %v23_v6  ;;  %v17_v31 = vld [vmem:[%s603_s0 + $0x30] sm:$0xff] }
   0x6   :  { %490 = vlog2.f32 %v24_v7 }
   0x7   :  { %463 = vmatpush3.xpose.msk.msra.mxu0 %vm67_vm0, %v11_v2  ;;  %470 = vmatpush3.xpose.msk.msra.mxu1 %vm67_vm0, %v13_v3  ;;  %492 = vlog2.f32 %v25_v9 }
   0x8   :  { %474 = vmatprep.subr.msk.mxu0 %vm67_vm0, %v16_v11  ;;  %494 = vlog2.f32 %v26_v13  ;;  %481 = vmatprep.subr.msk.mxu1 %vm67_vm0, %v18_v12 }
  0x12   :  { %v489_v17 = vpop.eup %488 }
  0x13   :  { %v491_v18 = vpop.eup %490  ;;  %v28_v19 = vmul.f32 0.6931472, %v489_v17 }
  0x14   :  { %v493_v20 = vpop.eup %492  ;;  %v30_v21 = vmul.f32 0.6931472, %v491_v18 }
  0x15   :  { %v495_v22 = vpop.eup %494  ;;  %v42_v23 = vrot.slane %v28_v19, %v41_v16  ;;  %v32_v24 = vmul.f32 0.6931472, %v493_v20 }
  0x16   :  { %v46_v25 = vrot.slane %v30_v21, %v41_v16  ;;  %v34_v26 = vmul.f32 0.6931472, %v495_v22 }
  0x17   :  { %v59_v28 = vmul.f32 %v42_v23, %v11_v2  ;;  %v60_v29 = vmul.f32 %v42_v23, %v12_v0  ;;  %v50_v30 = vrot.slane %v32_v24, %v41_v16 }
  0x18   :  { %v61_v32 = vmul.f32 %v46_v25, %v13_v3  ;;  %v62_v33 = vmul.f32 %v46_v25, %v14_v1  ;;  %v54_v34 = vrot.slane %v34_v26, %v41_v16 }
  0x19   :  { %464 = vmatprep.mubr.msk.f32.mxu0 %vm67_vm0, %v59_v28  ;;  %v63_v35 = vmul.f32 %v50_v30, %v15_v27  ;;  %v64_v37 = vmul.f32 %v50_v30, %v16_v11 }
  0x1a   :  { %471 = vmatprep.mubr.msk.f32.mxu1 %vm67_vm0, %v61_v32  ;;  %465 = vmatmul.mubr.msk.f32.vlgmr.msra.gmra.mxu0 %vm67_vm0, %v60_v29  ;;  %v65_v36 = vmul.f32 %v54_v34, %v17_v31  ;;  %v66_v38 = vmul.f32 %v54_v34, %v18_v12 }
  0x1b   :  { %472 = vmatmul.mubr.msk.f32.vlgmr.msra.gmra.mxu1 %vm67_vm0, %v62_v33  ;;  %475 = vmatpush3.xpose.msk.msra.mxu0 %vm67_vm0, %v16_v11 }
  0x1c   :  { %482 = vmatpush3.xpose.msk.msra.mxu1 %vm67_vm0, %v18_v12  ;;  %476 = vmatprep.subr.msk.mxu0 %vm67_vm0, %v15_v27 }
  0x1d   :  { %483 = vmatprep.subr.msk.mxu1 %vm67_vm0, %v17_v31  ;;  %478 = vmatprep.mubr.msk.f32.mxu0 %vm67_vm0, %v63_v35 }
  0x1e   :  { %485 = vmatprep.mubr.msk.f32.mxu1 %vm67_vm0, %v65_v36 }
  0x1f   :  { %477 = vmatpush3.xpose.msk.msra.mxu0 %vm67_vm0, %v15_v27 }
  0x20   :  { %484 = vmatpush3.xpose.msk.msra.mxu1 %vm67_vm0, %v17_v31 }
  0x22   :  { %479 = vmatmul.mubr.msk.f32.vlgmr.msra.gmra.mxu0 %vm67_vm0, %v64_v37 }
  0x23   :  { %486 = vmatmul.mubr.msk.f32.vlgmr.msra.gmra.mxu1 %vm67_vm0, %v66_v38 }
  0xda   :  { %v466_v39 = vpop.f32.mrf.mxu0 }
  0xdb   :  { %417 = vst.msk [vmem:[%s605_s2 + $0x8] sm:$0xff] %vm67_vm0, %v466_v39  ;;  %v473_v40 = vpop.f32.mrf.mxu1 }
  0xdc   :  { %419 = vst.msk [vmem:[%s605_s2 + $0x18] sm:$0xff] %vm67_vm0, %v473_v40  ;;  %v146_v41 = vpop.f32.mrf.mxu0 }
  0xdd   :  { %416 = vst.msk [vmem:[%s605_s2] sm:$0xff] %vm67_vm0, %v146_v41  ;;  %v233_v42 = vpop.f32.mrf.mxu1 }
  0xde   :  { %418 = vst.msk [vmem:[%s605_s2 + $0x10] sm:$0xff] %vm67_vm0, %v233_v42 }
  0xe2   :  { %v480_v43 = vpop.f32.mrf.mxu0 }
  0xe3   :  { %421 = vst.msk [vmem:[%s605_s2 + $0x28] sm:$0xff] %vm67_vm0, %v480_v43  ;;  %v487_v44 = vpop.f32.mrf.mxu1 }
  0xe4   :  { %423 = vst.msk [vmem:[%s605_s2 + $0x38] sm:$0xff] %vm67_vm0, %v487_v44  ;;  %v320_v45 = vpop.f32.mrf.mxu0 }
  0xe5   :  { %420 = vst.msk [vmem:[%s605_s2 + $0x20] sm:$0xff] %vm67_vm0, %v320_v45  ;;  %v407_v46 = vpop.f32.mrf.mxu1 }
  0xe6   :  { %422 = vst.msk [vmem:[%s605_s2 + $0x30] sm:$0xff] %vm67_vm0, %v407_v46 }

</bundles_post_ra>
